<compile_context>
chip_gen: v7x
topology: tpu7x:2x2x1
jax: 0.10.0
libtpu: 0.0.40
codegen_flags: <defaults>
</compile_context>

<pallas_src>
import jax
import jax.numpy as jnp
from jax.experimental import pallas as pl
from jax.experimental.pallas import tpu as pltpu


def _round_up(n, m):
    return ((n + m - 1) // m) * m


def _make_kan_kernel(H, n_j, n_k, mxu_dtype):
    """Build the kernel for a fixed (H, #Dout tiles, #Din tiles) config."""
    cache_basis = n_j > 1     # basis reused across Dout tiles
    use_acc = n_k > 1         # Din is a real reduction axis

    def kernel(x_ref, w1_ref, b1_ref, w2_ref, b2_ref, ws_ref, out_ref, *scratch):
        si = 0
        if cache_basis:
            basis_ref = scratch[si]; si += 1
        if use_acc:
            acc_ref = scratch[si]; si += 1

        j = pl.program_id(1)
        k = pl.program_id(2)

        def compute_basis():
            # Fused 1->H->1 MLP on the (b_tile, din_t) slab.  Pure VPU/EUP:
            # one sublane-broadcast weight row per h, one tanh per element.
            x = x_ref[...]
            w1 = w1_ref[...]
            b1 = b1_ref[...]
            w2 = w2_ref[...]
            acc = jnp.zeros_like(x)
            for h in range(H):
                t = x * w1[h:h + 1, :] + b1[h:h + 1, :]
                # SiLU(t) = t * sigmoid(t); sigmoid via tanh keeps the
                # transcendental on the EUP slot (no VALU divide).
                s = t * (0.5 * jnp.tanh(0.5 * t) + 0.5)
                acc = acc + s * w2[h:h + 1, :]
            return acc + b2_ref[...]

        if cache_basis:
            @pl.when(j == 0)
            def _():
                basis_ref[k] = compute_basis()
            basis = basis_ref[k]
        else:
            basis = compute_basis()

        # Only MXU work in the kernel: (b_tile, din_t) @ (din_t, dout_t).
        partial = jnp.dot(basis.astype(mxu_dtype), ws_ref[...],
                          preferred_element_type=jnp.float32)

        if use_acc:
            @pl.when(k == 0)
            def _():
                acc_ref[...] = jnp.zeros_like(acc_ref)

            acc_ref[...] += partial

            @pl.when(k == pl.num_programs(2) - 1)
            def _():
                out_ref[...] = acc_ref[...].astype(out_ref.dtype)
        else:
            out_ref[...] = partial.astype(out_ref.dtype)

    return kernel


def kan_layer_pallas(x, w1, b1, w2, b2, wsum_t, *, b_tile=None, dout_tile=128,
                     mxu_dtype=jnp.float32):
    """y = KANLayer(x).

    x:        (B, Din)
    w1/b1/w2: (Din, H)   per-input Linear(1,H) weight/bias, Linear(H,1) weight
    b2:       (1, Din)   per-input Linear(H,1) bias
    wsum_t:   (Din, Dout) == (sum_k W[o, i, k]) transposed
    """
    B, Din = x.shape
    H = w1.shape[1]
    Dout = wsum_t.shape[1]
    f32 = jnp.float32
    assert dout_tile % 128 == 0

    # --- tile sizing: lane-dense, Din/Dout padded to multiples of 128 --------
    din_t = 128
    din_pad = _round_up(Din, din_t)
    n_k = din_pad // din_t

    dout_t = dout_tile
    dout_pad = _round_up(Dout, dout_t)
    n_j = dout_pad // dout_t

    if b_tile is None:
        b_tile = min(512, _round_up(B, 8))
        # Prefer >=2 batch blocks so both v7x TensorCores get work on the
        # (only) parallel grid axis.
        if B > 8 and _round_up(B, b_tile) // b_tile < 2:
            b_tile = _round_up(b_tile // 2, 8)
    b_pad = _round_up(B, b_tile)
    n_i = b_pad // b_tile

    # --- host-side repack: tiny transposes/pads only (no block-diag blowup) --
    def pad2(a, rows, cols):
        return jnp.pad(a, ((0, rows - a.shape[0]), (0, cols - a.shape[1])))

    xp = pad2(x.astype(f32), b_pad, din_pad)                  # (b_pad, din_pad)
    w1t = pad2(w1.astype(f32).T, H, din_pad)                  # (H, din_pad)
    b1t = pad2(b1.astype(f32).T, H, din_pad)
    w2t = pad2(w2.astype(f32).T, H, din_pad)
    b2p = pad2(b2.astype(f32).reshape(1, -1), 1, din_pad)     # (1, din_pad)
    wsp = pad2(wsum_t.astype(f32), din_pad, dout_pad).astype(mxu_dtype)

    grid = (n_i, n_j, n_k)

    scratch_shapes = []
    if n_j > 1:   # cache basis across Dout tiles
        scratch_shapes.append(pltpu.VMEM((n_k, b_tile, din_t), f32))
    if n_k > 1:   # f32 accumulator for the Din reduction
        scratch_shapes.append(pltpu.VMEM((b_tile, dout_t), f32))

    # --- advisory cost estimate ----------------------------------------------
    itemsz = jnp.dtype(mxu_dtype).itemsize
    mm_steps = n_i * n_j * n_k
    basis_steps = n_i * n_k
    flops = (mm_steps * 2 * b_tile * din_t * dout_t
             + basis_steps * b_tile * din_t * (7 * H + 1))
    transcendentals = basis_steps * b_tile * din_t * H
    bytes_accessed = int(4 * b_pad * din_pad * n_j
                         + 4 * (3 * H + 1) * din_pad * n_i * n_j
                         + itemsz * din_pad * dout_pad * n_i
                         + 4 * b_pad * dout_pad)

    # --- VMEM budget from actual tile sizes (headroom under v7x 64 MiB/TC) ---
    in_block_bytes = (4 * b_tile * din_t + 4 * (3 * H + 1) * din_t
                      + itemsz * din_t * dout_t)
    out_block_bytes = 4 * b_tile * dout_t
    scratch_bytes = ((4 * n_k * b_tile * din_t if n_j > 1 else 0)
                     + (4 * b_tile * dout_t if n_k > 1 else 0))
    vmem_need = 2 * (in_block_bytes + out_block_bytes) + scratch_bytes
    vmem_limit = int(min(max(4 * vmem_need, 16 << 20), 48 << 20))

    kernel = _make_kan_kernel(H, n_j, n_k, mxu_dtype)

    out = pl.pallas_call(
        kernel,
        out_shape=jax.ShapeDtypeStruct((b_pad, dout_pad), f32),
        grid_spec=pltpu.PrefetchScalarGridSpec(
            num_scalar_prefetch=0,
            grid=grid,
            in_specs=[
                pl.BlockSpec((b_tile, din_t), lambda i, j, k: (i, k)),   # x
                pl.BlockSpec((H, din_t), lambda i, j, k: (0, k)),        # w1
                pl.BlockSpec((H, din_t), lambda i, j, k: (0, k)),        # b1
                pl.BlockSpec((H, din_t), lambda i, j, k: (0, k)),        # w2
                pl.BlockSpec((1, din_t), lambda i, j, k: (0, k)),        # b2
                pl.BlockSpec((din_t, dout_t), lambda i, j, k: (k, j)),   # wsum_t
            ],
            out_specs=pl.BlockSpec((b_tile, dout_t), lambda i, j, k: (i, j)),
            scratch_shapes=scratch_shapes,
        ),
        compiler_params=pltpu.CompilerParams(
            # j must stay "arbitrary": the basis cache is filled at j == 0.
            dimension_semantics=("parallel", "arbitrary", "arbitrary"),
            vmem_limit_bytes=vmem_limit,
        ),
        cost_estimate=pl.CostEstimate(
            flops=int(flops),
            transcendentals=int(transcendentals),
            bytes_accessed=bytes_accessed,
        ),
    )(xp, w1t, b1t, w2t, b2p, wsp)

    return out[:B, :Dout]


def kan_layer_ref(x, w1, b1, w2, b2, wsum_t):
    """Pure-JAX reference mirroring the PyTorch loops."""
    h = x[:, :, None] * w1[None, :, :] + b1[None, :, :]
    h = h * jax.nn.sigmoid(h)
    basis = jnp.sum(h * w2[None, :, :], axis=-1) + b2
    return basis @ wsum_t


if __name__ == "__main__":
    # Small shapes consistent with the module.
    batch = 8
    input_dim = 4
    output_dim = 6
    num_basis = 5   # only the first `input_dim` basis MLPs are used (as in PyTorch)
    hidden = 16

    key = jax.random.PRNGKey(0)
    kx, kw, k1w, k1b, k2w, k2b = jax.random.split(key, 6)

    # Deterministic synthetic parameters (shapes match __init__).
    x = jax.random.normal(kx, (batch, input_dim), dtype=jnp.float32)
    W = jax.random.normal(kw, (output_dim, input_dim, num_basis), dtype=jnp.float32)
    w1_all = jax.random.normal(k1w, (num_basis, hidden), dtype=jnp.float32) * 0.5
    b1_all = jax.random.normal(k1b, (num_basis, hidden), dtype=jnp.float32) * 0.1
    w2_all = jax.random.normal(k2w, (num_basis, hidden), dtype=jnp.float32) * 0.2
    b2_all = jax.random.normal(k2b, (num_basis,), dtype=jnp.float32) * 0.1

    w1 = w1_all[:input_dim]                        # (Din, H)
    b1 = b1_all[:input_dim]                        # (Din, H)
    w2 = w2_all[:input_dim]                        # (Din, H)
    b2 = b2_all[:input_dim].reshape(1, input_dim)  # (1, Din)

    # sum_k weight * basis_output  ==  basis * sum_k W[o, i, k]
    wsum_t = jnp.sum(W, axis=-1).T                 # (Din, Dout)

    kan = jax.jit(kan_layer_pallas)
    y = jax.block_until_ready(kan(x, w1, b1, w2, b2, wsum_t))

    y_ref = kan_layer_ref(x, w1, b1, w2, b2, wsum_t)
    assert y.shape == (batch, output_dim)
    max_err = float(jnp.max(jnp.abs(y - y_ref)))
    assert jnp.allclose(y, y_ref, atol=2e-3, rtol=2e-3), f"max err {max_err}"

    print("KERNEL_OK")
</pallas_src>

<mosaic_0001>
module attributes {stable_mosaic.version = 11 : i64} {
  func.func @kernel(%arg0: i32, %arg1: i32, %arg2: i32, %arg3: memref<8x128xf32, #tpu.memory_space<vmem>>, %arg4: memref<16x128xf32, #tpu.memory_space<vmem>>, %arg5: memref<16x128xf32, #tpu.memory_space<vmem>>, %arg6: memref<16x128xf32, #tpu.memory_space<vmem>>, %arg7: memref<1x128xf32, #tpu.memory_space<vmem>>, %arg8: memref<128x128xf32, #tpu.memory_space<vmem>>, %arg9: memref<8x128xf32, #tpu.memory_space<vmem>>) attributes {dimension_semantics = [#tpu.dimension_semantics<parallel>, #tpu.dimension_semantics<arbitrary>, #tpu.dimension_semantics<arbitrary>], iteration_bounds = array<i64: 1, 1, 1>, scalar_prefetch = 0 : i64, scratch_operands = 0 : i64, tpu.core_type = #tpu.core_type<tc>, window_params = [{transform_indices = @transform_0, window_bounds = array<i64: 8, 128>}, {transform_indices = @transform_1, window_bounds = array<i64: 16, 128>}, {transform_indices = @transform_2, window_bounds = array<i64: 16, 128>}, {transform_indices = @transform_3, window_bounds = array<i64: 16, 128>}, {transform_indices = @transform_4, window_bounds = array<i64: 1, 128>}, {transform_indices = @transform_5, window_bounds = array<i64: 128, 128>}, {transform_indices = @transform_6, window_bounds = array<i64: 8, 128>}]} {
    %c0 = arith.constant 0 : index
    %c0_0 = arith.constant 0 : index
    %0 = vector.load %arg3[%c0, %c0_0] : memref<8x128xf32, #tpu.memory_space<vmem>>, vector<8x128xf32>
    %c0_1 = arith.constant 0 : index
    %c0_2 = arith.constant 0 : index
    %1 = vector.load %arg4[%c0_1, %c0_2] : memref<16x128xf32, #tpu.memory_space<vmem>>, vector<16x128xf32>
    %c0_3 = arith.constant 0 : index
    %c0_4 = arith.constant 0 : index
    %2 = vector.load %arg5[%c0_3, %c0_4] : memref<16x128xf32, #tpu.memory_space<vmem>>, vector<16x128xf32>
    %c0_5 = arith.constant 0 : index
    %c0_6 = arith.constant 0 : index
    %3 = vector.load %arg6[%c0_5, %c0_6] : memref<16x128xf32, #tpu.memory_space<vmem>>, vector<16x128xf32>
    %cst = arith.constant 0.000000e+00 : f32
    %4 = vector.broadcast %cst : f32 to vector<8x128xf32>
    %5 = vector.extract_strided_slice %1 {offsets = [0, 0], sizes = [1, 128], strides = [1, 1]} : vector<16x128xf32> to vector<1x128xf32>
    %6 = vector.broadcast %5 : vector<1x128xf32> to vector<8x128xf32>
    %7 = arith.mulf %0, %6 : vector<8x128xf32>
    %8 = vector.extract_strided_slice %2 {offsets = [0, 0], sizes = [1, 128], strides = [1, 1]} : vector<16x128xf32> to vector<1x128xf32>
    %9 = vector.broadcast %8 : vector<1x128xf32> to vector<8x128xf32>
    %10 = arith.addf %7, %9 : vector<8x128xf32>
    %cst_7 = arith.constant 5.000000e-01 : f32
    %11 = vector.broadcast %cst_7 : f32 to vector<8x128xf32>
    %12 = arith.mulf %11, %10 : vector<8x128xf32>
    %13 = math.tanh %12 : vector<8x128xf32>
    %cst_8 = arith.constant 5.000000e-01 : f32
    %14 = vector.broadcast %cst_8 : f32 to vector<8x128xf32>
    %15 = arith.mulf %14, %13 : vector<8x128xf32>
    %cst_9 = arith.constant 5.000000e-01 : f32
    %16 = vector.broadcast %cst_9 : f32 to vector<8x128xf32>
    %17 = arith.addf %15, %16 : vector<8x128xf32>
    %18 = arith.mulf %10, %17 : vector<8x128xf32>
    %19 = vector.extract_strided_slice %3 {offsets = [0, 0], sizes = [1, 128], strides = [1, 1]} : vector<16x128xf32> to vector<1x128xf32>
    %20 = vector.broadcast %19 : vector<1x128xf32> to vector<8x128xf32>
    %21 = arith.mulf %18, %20 : vector<8x128xf32>
    %22 = arith.addf %4, %21 : vector<8x128xf32>
    %23 = vector.extract_strided_slice %1 {offsets = [1, 0], sizes = [1, 128], strides = [1, 1]} : vector<16x128xf32> to vector<1x128xf32>
    %24 = vector.broadcast %23 : vector<1x128xf32> to vector<8x128xf32>
    %25 = arith.mulf %0, %24 : vector<8x128xf32>
    %26 = vector.extract_strided_slice %2 {offsets = [1, 0], sizes = [1, 128], strides = [1, 1]} : vector<16x128xf32> to vector<1x128xf32>
    %27 = vector.broadcast %26 : vector<1x128xf32> to vector<8x128xf32>
    %28 = arith.addf %25, %27 : vector<8x128xf32>
    %cst_10 = arith.constant 5.000000e-01 : f32
    %29 = vector.broadcast %cst_10 : f32 to vector<8x128xf32>
    %30 = arith.mulf %29, %28 : vector<8x128xf32>
    %31 = math.tanh %30 : vector<8x128xf32>
    %cst_11 = arith.constant 5.000000e-01 : f32
    %32 = vector.broadcast %cst_11 : f32 to vector<8x128xf32>
    %33 = arith.mulf %32, %31 : vector<8x128xf32>
    %cst_12 = arith.constant 5.000000e-01 : f32
    %34 = vector.broadcast %cst_12 : f32 to vector<8x128xf32>
    %35 = arith.addf %33, %34 : vector<8x128xf32>
    %36 = arith.mulf %28, %35 : vector<8x128xf32>
    %37 = vector.extract_strided_slice %3 {offsets = [1, 0], sizes = [1, 128], strides = [1, 1]} : vector<16x128xf32> to vector<1x128xf32>
    %38 = vector.broadcast %37 : vector<1x128xf32> to vector<8x128xf32>
    %39 = arith.mulf %36, %38 : vector<8x128xf32>
    %40 = arith.addf %22, %39 : vector<8x128xf32>
    %41 = vector.extract_strided_slice %1 {offsets = [2, 0], sizes = [1, 128], strides = [1, 1]} : vector<16x128xf32> to vector<1x128xf32>
    %42 = vector.broadcast %41 : vector<1x128xf32> to vector<8x128xf32>
    %43 = arith.mulf %0, %42 : vector<8x128xf32>
    %44 = vector.extract_strided_slice %2 {offsets = [2, 0], sizes = [1, 128], strides = [1, 1]} : vector<16x128xf32> to vector<1x128xf32>
    %45 = vector.broadcast %44 : vector<1x128xf32> to vector<8x128xf32>
    %46 = arith.addf %43, %45 : vector<8x128xf32>
    %cst_13 = arith.constant 5.000000e-01 : f32
    %47 = vector.broadcast %cst_13 : f32 to vector<8x128xf32>
    %48 = arith.mulf %47, %46 : vector<8x128xf32>
    %49 = math.tanh %48 : vector<8x128xf32>
    %cst_14 = arith.constant 5.000000e-01 : f32
    %50 = vector.broadcast %cst_14 : f32 to vector<8x128xf32>
    %51 = arith.mulf %50, %49 : vector<8x128xf32>
    %cst_15 = arith.constant 5.000000e-01 : f32
    %52 = vector.broadcast %cst_15 : f32 to vector<8x128xf32>
    %53 = arith.addf %51, %52 : vector<8x128xf32>
    %54 = arith.mulf %46, %53 : vector<8x128xf32>
    %55 = vector.extract_strided_slice %3 {offsets = [2, 0], sizes = [1, 128], strides = [1, 1]} : vector<16x128xf32> to vector<1x128xf32>
    %56 = vector.broadcast %55 : vector<1x128xf32> to vector<8x128xf32>
    %57 = arith.mulf %54, %56 : vector<8x128xf32>
    %58 = arith.addf %40, %57 : vector<8x128xf32>
    %59 = vector.extract_strided_slice %1 {offsets = [3, 0], sizes = [1, 128], strides = [1, 1]} : vector<16x128xf32> to vector<1x128xf32>
    %60 = vector.broadcast %59 : vector<1x128xf32> to vector<8x128xf32>
    %61 = arith.mulf %0, %60 : vector<8x128xf32>
    %62 = vector.extract_strided_slice %2 {offsets = [3, 0], sizes = [1, 128], strides = [1, 1]} : vector<16x128xf32> to vector<1x128xf32>
    %63 = vector.broadcast %62 : vector<1x128xf32> to vector<8x128xf32>
    %64 = arith.addf %61, %63 : vector<8x128xf32>
    %cst_16 = arith.constant 5.000000e-01 : f32
    %65 = vector.broadcast %cst_16 : f32 to vector<8x128xf32>
    %66 = arith.mulf %65, %64 : vector<8x128xf32>
    %67 = math.tanh %66 : vector<8x128xf32>
    %cst_17 = arith.constant 5.000000e-01 : f32
    %68 = vector.broadcast %cst_17 : f32 to vector<8x128xf32>
    %69 = arith.mulf %68, %67 : vector<8x128xf32>
    %cst_18 = arith.constant 5.000000e-01 : f32
    %70 = vector.broadcast %cst_18 : f32 to vector<8x128xf32>
    %71 = arith.addf %69, %70 : vector<8x128xf32>
    %72 = arith.mulf %64, %71 : vector<8x128xf32>
    %73 = vector.extract_strided_slice %3 {offsets = [3, 0], sizes = [1, 128], strides = [1, 1]} : vector<16x128xf32> to vector<1x128xf32>
    %74 = vector.broadcast %73 : vector<1x128xf32> to vector<8x128xf32>
    %75 = arith.mulf %72, %74 : vector<8x128xf32>
    %76 = arith.addf %58, %75 : vector<8x128xf32>
    %77 = vector.extract_strided_slice %1 {offsets = [4, 0], sizes = [1, 128], strides = [1, 1]} : vector<16x128xf32> to vector<1x128xf32>
    %78 = vector.broadcast %77 : vector<1x128xf32> to vector<8x128xf32>
    %79 = arith.mulf %0, %78 : vector<8x128xf32>
    %80 = vector.extract_strided_slice %2 {offsets = [4, 0], sizes = [1, 128], strides = [1, 1]} : vector<16x128xf32> to vector<1x128xf32>
    %81 = vector.broadcast %80 : vector<1x128xf32> to vector<8x128xf32>
    %82 = arith.addf %79, %81 : vector<8x128xf32>
    %cst_19 = arith.constant 5.000000e-01 : f32
    %83 = vector.broadcast %cst_19 : f32 to vector<8x128xf32>
    %84 = arith.mulf %83, %82 : vector<8x128xf32>
    %85 = math.tanh %84 : vector<8x128xf32>
    %cst_20 = arith.constant 5.000000e-01 : f32
    %86 = vector.broadcast %cst_20 : f32 to vector<8x128xf32>
    %87 = arith.mulf %86, %85 : vector<8x128xf32>
    %cst_21 = arith.constant 5.000000e-01 : f32
    %88 = vector.broadcast %cst_21 : f32 to vector<8x128xf32>
    %89 = arith.addf %87, %88 : vector<8x128xf32>
    %90 = arith.mulf %82, %89 : vector<8x128xf32>
    %91 = vector.extract_strided_slice %3 {offsets = [4, 0], sizes = [1, 128], strides = [1, 1]} : vector<16x128xf32> to vector<1x128xf32>
    %92 = vector.broadcast %91 : vector<1x128xf32> to vector<8x128xf32>
    %93 = arith.mulf %90, %92 : vector<8x128xf32>
    %94 = arith.addf %76, %93 : vector<8x128xf32>
    %95 = vector.extract_strided_slice %1 {offsets = [5, 0], sizes = [1, 128], strides = [1, 1]} : vector<16x128xf32> to vector<1x128xf32>
    %96 = vector.broadcast %95 : vector<1x128xf32> to vector<8x128xf32>
    %97 = arith.mulf %0, %96 : vector<8x128xf32>
    %98 = vector.extract_strided_slice %2 {offsets = [5, 0], sizes = [1, 128], strides = [1, 1]} : vector<16x128xf32> to vector<1x128xf32>
    %99 = vector.broadcast %98 : vector<1x128xf32> to vector<8x128xf32>
    %100 = arith.addf %97, %99 : vector<8x128xf32>
    %cst_22 = arith.constant 5.000000e-01 : f32
    %101 = vector.broadcast %cst_22 : f32 to vector<8x128xf32>
    %102 = arith.mulf %101, %100 : vector<8x128xf32>
    %103 = math.tanh %102 : vector<8x128xf32>
    %cst_23 = arith.constant 5.000000e-01 : f32
    %104 = vector.broadcast %cst_23 : f32 to vector<8x128xf32>
    %105 = arith.mulf %104, %103 : vector<8x128xf32>
    %cst_24 = arith.constant 5.000000e-01 : f32
    %106 = vector.broadcast %cst_24 : f32 to vector<8x128xf32>
    %107 = arith.addf %105, %106 : vector<8x128xf32>
    %108 = arith.mulf %100, %107 : vector<8x128xf32>
    %109 = vector.extract_strided_slice %3 {offsets = [5, 0], sizes = [1, 128], strides = [1, 1]} : vector<16x128xf32> to vector<1x128xf32>
    %110 = vector.broadcast %109 : vector<1x128xf32> to vector<8x128xf32>
    %111 = arith.mulf %108, %110 : vector<8x128xf32>
    %112 = arith.addf %94, %111 : vector<8x128xf32>
    %113 = vector.extract_strided_slice %1 {offsets = [6, 0], sizes = [1, 128], strides = [1, 1]} : vector<16x128xf32> to vector<1x128xf32>
    %114 = vector.broadcast %113 : vector<1x128xf32> to vector<8x128xf32>
    %115 = arith.mulf %0, %114 : vector<8x128xf32>
    %116 = vector.extract_strided_slice %2 {offsets = [6, 0], sizes = [1, 128], strides = [1, 1]} : vector<16x128xf32> to vector<1x128xf32>
    %117 = vector.broadcast %116 : vector<1x128xf32> to vector<8x128xf32>
    %118 = arith.addf %115, %117 : vector<8x128xf32>
    %cst_25 = arith.constant 5.000000e-01 : f32
    %119 = vector.broadcast %cst_25 : f32 to vector<8x128xf32>
    %120 = arith.mulf %119, %118 : vector<8x128xf32>
    %121 = math.tanh %120 : vector<8x128xf32>
    %cst_26 = arith.constant 5.000000e-01 : f32
    %122 = vector.broadcast %cst_26 : f32 to vector<8x128xf32>
    %123 = arith.mulf %122, %121 : vector<8x128xf32>
    %cst_27 = arith.constant 5.000000e-01 : f32
    %124 = vector.broadcast %cst_27 : f32 to vector<8x128xf32>
    %125 = arith.addf %123, %124 : vector<8x128xf32>
    %126 = arith.mulf %118, %125 : vector<8x128xf32>
    %127 = vector.extract_strided_slice %3 {offsets = [6, 0], sizes = [1, 128], strides = [1, 1]} : vector<16x128xf32> to vector<1x128xf32>
    %128 = vector.broadcast %127 : vector<1x128xf32> to vector<8x128xf32>
    %129 = arith.mulf %126, %128 : vector<8x128xf32>
    %130 = arith.addf %112, %129 : vector<8x128xf32>
    %131 = vector.extract_strided_slice %1 {offsets = [7, 0], sizes = [1, 128], strides = [1, 1]} : vector<16x128xf32> to vector<1x128xf32>
    %132 = vector.broadcast %131 : vector<1x128xf32> to vector<8x128xf32>
    %133 = arith.mulf %0, %132 : vector<8x128xf32>
    %134 = vector.extract_strided_slice %2 {offsets = [7, 0], sizes = [1, 128], strides = [1, 1]} : vector<16x128xf32> to vector<1x128xf32>
    %135 = vector.broadcast %134 : vector<1x128xf32> to vector<8x128xf32>
    %136 = arith.addf %133, %135 : vector<8x128xf32>
    %cst_28 = arith.constant 5.000000e-01 : f32
    %137 = vector.broadcast %cst_28 : f32 to vector<8x128xf32>
    %138 = arith.mulf %137, %136 : vector<8x128xf32>
    %139 = math.tanh %138 : vector<8x128xf32>
    %cst_29 = arith.constant 5.000000e-01 : f32
    %140 = vector.broadcast %cst_29 : f32 to vector<8x128xf32>
    %141 = arith.mulf %140, %139 : vector<8x128xf32>
    %cst_30 = arith.constant 5.000000e-01 : f32
    %142 = vector.broadcast %cst_30 : f32 to vector<8x128xf32>
    %143 = arith.addf %141, %142 : vector<8x128xf32>
    %144 = arith.mulf %136, %143 : vector<8x128xf32>
    %145 = vector.extract_strided_slice %3 {offsets = [7, 0], sizes = [1, 128], strides = [1, 1]} : vector<16x128xf32> to vector<1x128xf32>
    %146 = vector.broadcast %145 : vector<1x128xf32> to vector<8x128xf32>
    %147 = arith.mulf %144, %146 : vector<8x128xf32>
    %148 = arith.addf %130, %147 : vector<8x128xf32>
    %149 = vector.extract_strided_slice %1 {offsets = [8, 0], sizes = [1, 128], strides = [1, 1]} : vector<16x128xf32> to vector<1x128xf32>
    %150 = vector.broadcast %149 : vector<1x128xf32> to vector<8x128xf32>
    %151 = arith.mulf %0, %150 : vector<8x128xf32>
    %152 = vector.extract_strided_slice %2 {offsets = [8, 0], sizes = [1, 128], strides = [1, 1]} : vector<16x128xf32> to vector<1x128xf32>
    %153 = vector.broadcast %152 : vector<1x128xf32> to vector<8x128xf32>
    %154 = arith.addf %151, %153 : vector<8x128xf32>
    %cst_31 = arith.constant 5.000000e-01 : f32
    %155 = vector.broadcast %cst_31 : f32 to vector<8x128xf32>
    %156 = arith.mulf %155, %154 : vector<8x128xf32>
    %157 = math.tanh %156 : vector<8x128xf32>
    %cst_32 = arith.constant 5.000000e-01 : f32
    %158 = vector.broadcast %cst_32 : f32 to vector<8x128xf32>
    %159 = arith.mulf %158, %157 : vector<8x128xf32>
    %cst_33 = arith.constant 5.000000e-01 : f32
    %160 = vector.broadcast %cst_33 : f32 to vector<8x128xf32>
    %161 = arith.addf %159, %160 : vector<8x128xf32>
    %162 = arith.mulf %154, %161 : vector<8x128xf32>
    %163 = vector.extract_strided_slice %3 {offsets = [8, 0], sizes = [1, 128], strides = [1, 1]} : vector<16x128xf32> to vector<1x128xf32>
    %164 = vector.broadcast %163 : vector<1x128xf32> to vector<8x128xf32>
    %165 = arith.mulf %162, %164 : vector<8x128xf32>
    %166 = arith.addf %148, %165 : vector<8x128xf32>
    %167 = vector.extract_strided_slice %1 {offsets = [9, 0], sizes = [1, 128], strides = [1, 1]} : vector<16x128xf32> to vector<1x128xf32>
    %168 = vector.broadcast %167 : vector<1x128xf32> to vector<8x128xf32>
    %169 = arith.mulf %0, %168 : vector<8x128xf32>
    %170 = vector.extract_strided_slice %2 {offsets = [9, 0], sizes = [1, 128], strides = [1, 1]} : vector<16x128xf32> to vector<1x128xf32>
    %171 = vector.broadcast %170 : vector<1x128xf32> to vector<8x128xf32>
    %172 = arith.addf %169, %171 : vector<8x128xf32>
    %cst_34 = arith.constant 5.000000e-01 : f32
    %173 = vector.broadcast %cst_34 : f32 to vector<8x128xf32>
    %174 = arith.mulf %173, %172 : vector<8x128xf32>
    %175 = math.tanh %174 : vector<8x128xf32>
    %cst_35 = arith.constant 5.000000e-01 : f32
    %176 = vector.broadcast %cst_35 : f32 to vector<8x128xf32>
    %177 = arith.mulf %176, %175 : vector<8x128xf32>
    %cst_36 = arith.constant 5.000000e-01 : f32
    %178 = vector.broadcast %cst_36 : f32 to vector<8x128xf32>
    %179 = arith.addf %177, %178 : vector<8x128xf32>
    %180 = arith.mulf %172, %179 : vector<8x128xf32>
    %181 = vector.extract_strided_slice %3 {offsets = [9, 0], sizes = [1, 128], strides = [1, 1]} : vector<16x128xf32> to vector<1x128xf32>
    %182 = vector.broadcast %181 : vector<1x128xf32> to vector<8x128xf32>
    %183 = arith.mulf %180, %182 : vector<8x128xf32>
    %184 = arith.addf %166, %183 : vector<8x128xf32>
    %185 = vector.extract_strided_slice %1 {offsets = [10, 0], sizes = [1, 128], strides = [1, 1]} : vector<16x128xf32> to vector<1x128xf32>
    %186 = vector.broadcast %185 : vector<1x128xf32> to vector<8x128xf32>
    %187 = arith.mulf %0, %186 : vector<8x128xf32>
    %188 = vector.extract_strided_slice %2 {offsets = [10, 0], sizes = [1, 128], strides = [1, 1]} : vector<16x128xf32> to vector<1x128xf32>
    %189 = vector.broadcast %188 : vector<1x128xf32> to vector<8x128xf32>
    %190 = arith.addf %187, %189 : vector<8x128xf32>
    %cst_37 = arith.constant 5.000000e-01 : f32
    %191 = vector.broadcast %cst_37 : f32 to vector<8x128xf32>
    %192 = arith.mulf %191, %190 : vector<8x128xf32>
    %193 = math.tanh %192 : vector<8x128xf32>
    %cst_38 = arith.constant 5.000000e-01 : f32
    %194 = vector.broadcast %cst_38 : f32 to vector<8x128xf32>
    %195 = arith.mulf %194, %193 : vector<8x128xf32>
    %cst_39 = arith.constant 5.000000e-01 : f32
    %196 = vector.broadcast %cst_39 : f32 to vector<8x128xf32>
    %197 = arith.addf %195, %196 : vector<8x128xf32>
    %198 = arith.mulf %190, %197 : vector<8x128xf32>
    %199 = vector.extract_strided_slice %3 {offsets = [10, 0], sizes = [1, 128], strides = [1, 1]} : vector<16x128xf32> to vector<1x128xf32>
    %200 = vector.broadcast %199 : vector<1x128xf32> to vector<8x128xf32>
    %201 = arith.mulf %198, %200 : vector<8x128xf32>
    %202 = arith.addf %184, %201 : vector<8x128xf32>
    %203 = vector.extract_strided_slice %1 {offsets = [11, 0], sizes = [1, 128], strides = [1, 1]} : vector<16x128xf32> to vector<1x128xf32>
    %204 = vector.broadcast %203 : vector<1x128xf32> to vector<8x128xf32>
    %205 = arith.mulf %0, %204 : vector<8x128xf32>
    %206 = vector.extract_strided_slice %2 {offsets = [11, 0], sizes = [1, 128], strides = [1, 1]} : vector<16x128xf32> to vector<1x128xf32>
    %207 = vector.broadcast %206 : vector<1x128xf32> to vector<8x128xf32>
    %208 = arith.addf %205, %207 : vector<8x128xf32>
    %cst_40 = arith.constant 5.000000e-01 : f32
    %209 = vector.broadcast %cst_40 : f32 to vector<8x128xf32>
    %210 = arith.mulf %209, %208 : vector<8x128xf32>
    %211 = math.tanh %210 : vector<8x128xf32>
    %cst_41 = arith.constant 5.000000e-01 : f32
    %212 = vector.broadcast %cst_41 : f32 to vector<8x128xf32>
    %213 = arith.mulf %212, %211 : vector<8x128xf32>
    %cst_42 = arith.constant 5.000000e-01 : f32
    %214 = vector.broadcast %cst_42 : f32 to vector<8x128xf32>
    %215 = arith.addf %213, %214 : vector<8x128xf32>
    %216 = arith.mulf %208, %215 : vector<8x128xf32>
    %217 = vector.extract_strided_slice %3 {offsets = [11, 0], sizes = [1, 128], strides = [1, 1]} : vector<16x128xf32> to vector<1x128xf32>
    %218 = vector.broadcast %217 : vector<1x128xf32> to vector<8x128xf32>
    %219 = arith.mulf %216, %218 : vector<8x128xf32>
    %220 = arith.addf %202, %219 : vector<8x128xf32>
    %221 = vector.extract_strided_slice %1 {offsets = [12, 0], sizes = [1, 128], strides = [1, 1]} : vector<16x128xf32> to vector<1x128xf32>
    %222 = vector.broadcast %221 : vector<1x128xf32> to vector<8x128xf32>
    %223 = arith.mulf %0, %222 : vector<8x128xf32>
    %224 = vector.extract_strided_slice %2 {offsets = [12, 0], sizes = [1, 128], strides = [1, 1]} : vector<16x128xf32> to vector<1x128xf32>
    %225 = vector.broadcast %224 : vector<1x128xf32> to vector<8x128xf32>
    %226 = arith.addf %223, %225 : vector<8x128xf32>
    %cst_43 = arith.constant 5.000000e-01 : f32
    %227 = vector.broadcast %cst_43 : f32 to vector<8x128xf32>
    %228 = arith.mulf %227, %226 : vector<8x128xf32>
    %229 = math.tanh %228 : vector<8x128xf32>
    %cst_44 = arith.constant 5.000000e-01 : f32
    %230 = vector.broadcast %cst_44 : f32 to vector<8x128xf32>
    %231 = arith.mulf %230, %229 : vector<8x128xf32>
    %cst_45 = arith.constant 5.000000e-01 : f32
    %232 = vector.broadcast %cst_45 : f32 to vector<8x128xf32>
    %233 = arith.addf %231, %232 : vector<8x128xf32>
    %234 = arith.mulf %226, %233 : vector<8x128xf32>
    %235 = vector.extract_strided_slice %3 {offsets = [12, 0], sizes = [1, 128], strides = [1, 1]} : vector<16x128xf32> to vector<1x128xf32>
    %236 = vector.broadcast %235 : vector<1x128xf32> to vector<8x128xf32>
    %237 = arith.mulf %234, %236 : vector<8x128xf32>
    %238 = arith.addf %220, %237 : vector<8x128xf32>
    %239 = vector.extract_strided_slice %1 {offsets = [13, 0], sizes = [1, 128], strides = [1, 1]} : vector<16x128xf32> to vector<1x128xf32>
    %240 = vector.broadcast %239 : vector<1x128xf32> to vector<8x128xf32>
    %241 = arith.mulf %0, %240 : vector<8x128xf32>
    %242 = vector.extract_strided_slice %2 {offsets = [13, 0], sizes = [1, 128], strides = [1, 1]} : vector<16x128xf32> to vector<1x128xf32>
    %243 = vector.broadcast %242 : vector<1x128xf32> to vector<8x128xf32>
    %244 = arith.addf %241, %243 : vector<8x128xf32>
    %cst_46 = arith.constant 5.000000e-01 : f32
    %245 = vector.broadcast %cst_46 : f32 to vector<8x128xf32>
    %246 = arith.mulf %245, %244 : vector<8x128xf32>
    %247 = math.tanh %246 : vector<8x128xf32>
    %cst_47 = arith.constant 5.000000e-01 : f32
    %248 = vector.broadcast %cst_47 : f32 to vector<8x128xf32>
    %249 = arith.mulf %248, %247 : vector<8x128xf32>
    %cst_48 = arith.constant 5.000000e-01 : f32
    %250 = vector.broadcast %cst_48 : f32 to vector<8x128xf32>
    %251 = arith.addf %249, %250 : vector<8x128xf32>
    %252 = arith.mulf %244, %251 : vector<8x128xf32>
    %253 = vector.extract_strided_slice %3 {offsets = [13, 0], sizes = [1, 128], strides = [1, 1]} : vector<16x128xf32> to vector<1x128xf32>
    %254 = vector.broadcast %253 : vector<1x128xf32> to vector<8x128xf32>
    %255 = arith.mulf %252, %254 : vector<8x128xf32>
    %256 = arith.addf %238, %255 : vector<8x128xf32>
    %257 = vector.extract_strided_slice %1 {offsets = [14, 0], sizes = [1, 128], strides = [1, 1]} : vector<16x128xf32> to vector<1x128xf32>
    %258 = vector.broadcast %257 : vector<1x128xf32> to vector<8x128xf32>
    %259 = arith.mulf %0, %258 : vector<8x128xf32>
    %260 = vector.extract_strided_slice %2 {offsets = [14, 0], sizes = [1, 128], strides = [1, 1]} : vector<16x128xf32> to vector<1x128xf32>
    %261 = vector.broadcast %260 : vector<1x128xf32> to vector<8x128xf32>
    %262 = arith.addf %259, %261 : vector<8x128xf32>
    %cst_49 = arith.constant 5.000000e-01 : f32
    %263 = vector.broadcast %cst_49 : f32 to vector<8x128xf32>
    %264 = arith.mulf %263, %262 : vector<8x128xf32>
    %265 = math.tanh %264 : vector<8x128xf32>
    %cst_50 = arith.constant 5.000000e-01 : f32
    %266 = vector.broadcast %cst_50 : f32 to vector<8x128xf32>
    %267 = arith.mulf %266, %265 : vector<8x128xf32>
    %cst_51 = arith.constant 5.000000e-01 : f32
    %268 = vector.broadcast %cst_51 : f32 to vector<8x128xf32>
    %269 = arith.addf %267, %268 : vector<8x128xf32>
    %270 = arith.mulf %262, %269 : vector<8x128xf32>
    %271 = vector.extract_strided_slice %3 {offsets = [14, 0], sizes = [1, 128], strides = [1, 1]} : vector<16x128xf32> to vector<1x128xf32>
    %272 = vector.broadcast %271 : vector<1x128xf32> to vector<8x128xf32>
    %273 = arith.mulf %270, %272 : vector<8x128xf32>
    %274 = arith.addf %256, %273 : vector<8x128xf32>
    %275 = vector.extract_strided_slice %1 {offsets = [15, 0], sizes = [1, 128], strides = [1, 1]} : vector<16x128xf32> to vector<1x128xf32>
    %276 = vector.broadcast %275 : vector<1x128xf32> to vector<8x128xf32>
    %277 = arith.mulf %0, %276 : vector<8x128xf32>
    %278 = vector.extract_strided_slice %2 {offsets = [15, 0], sizes = [1, 128], strides = [1, 1]} : vector<16x128xf32> to vector<1x128xf32>
    %279 = vector.broadcast %278 : vector<1x128xf32> to vector<8x128xf32>
    %280 = arith.addf %277, %279 : vector<8x128xf32>
    %cst_52 = arith.constant 5.000000e-01 : f32
    %281 = vector.broadcast %cst_52 : f32 to vector<8x128xf32>
    %282 = arith.mulf %281, %280 : vector<8x128xf32>
    %283 = math.tanh %282 : vector<8x128xf32>
    %cst_53 = arith.constant 5.000000e-01 : f32
    %284 = vector.broadcast %cst_53 : f32 to vector<8x128xf32>
    %285 = arith.mulf %284, %283 : vector<8x128xf32>
    %cst_54 = arith.constant 5.000000e-01 : f32
    %286 = vector.broadcast %cst_54 : f32 to vector<8x128xf32>
    %287 = arith.addf %285, %286 : vector<8x128xf32>
    %288 = arith.mulf %280, %287 : vector<8x128xf32>
    %289 = vector.extract_strided_slice %3 {offsets = [15, 0], sizes = [1, 128], strides = [1, 1]} : vector<16x128xf32> to vector<1x128xf32>
    %290 = vector.broadcast %289 : vector<1x128xf32> to vector<8x128xf32>
    %291 = arith.mulf %288, %290 : vector<8x128xf32>
    %292 = arith.addf %274, %291 : vector<8x128xf32>
    %c0_55 = arith.constant 0 : index
    %c0_56 = arith.constant 0 : index
    %293 = vector.load %arg7[%c0_55, %c0_56] : memref<1x128xf32, #tpu.memory_space<vmem>>, vector<1x128xf32>
    %294 = vector.broadcast %293 : vector<1x128xf32> to vector<8x128xf32>
    %295 = arith.addf %292, %294 : vector<8x128xf32>
    %c0_57 = arith.constant 0 : index
    %c0_58 = arith.constant 0 : index
    %296 = vector.load %arg8[%c0_57, %c0_58] : memref<128x128xf32, #tpu.memory_space<vmem>>, vector<128x128xf32>
    %cst_59 = arith.constant dense<0.000000e+00> : vector<8x128xf32>
    %297 = tpu.matmul %295, %296, %cst_59 {dimension_numbers = #tpu.dot_dimension_numbers<[1], [0], [0], [1], [0, 0, 1, 1], [], []>} : vector<8x128xf32>, vector<128x128xf32>, vector<8x128xf32> -> vector<8x128xf32>
    %c0_60 = arith.constant 0 : index
    %c0_61 = arith.constant 0 : index
    %298 = vector.load %arg9[%c0_60, %c0_61] : memref<8x128xf32, #tpu.memory_space<vmem>>, vector<8x128xf32>
    tpu.vector_store %arg9[%c0_60, %c0_61], %297 {strides = array<i32>} : memref<8x128xf32, #tpu.memory_space<vmem>>, vector<8x128xf32>,
    return
  }
  func.func @transform_0(%arg0: i32, %arg1: i32, %arg2: i32) -> (i32, i32) {
    %c0_i32 = arith.constant 0 : i32
    return %arg0, %arg2 : i32, i32
  }
  func.func @transform_1(%arg0: i32, %arg1: i32, %arg2: i32) -> (i32, i32) {
    %c0_i32 = arith.constant 0 : i32
    %c0_i32_0 = arith.constant 0 : i32
    return %c0_i32, %arg2 : i32, i32
  }
  func.func @transform_2(%arg0: i32, %arg1: i32, %arg2: i32) -> (i32, i32) {
    %c0_i32 = arith.constant 0 : i32
    %c0_i32_0 = arith.constant 0 : i32
    return %c0_i32, %arg2 : i32, i32
  }
  func.func @transform_3(%arg0: i32, %arg1: i32, %arg2: i32) -> (i32, i32) {
    %c0_i32 = arith.constant 0 : i32
    %c0_i32_0 = arith.constant 0 : i32
    return %c0_i32, %arg2 : i32, i32
  }
  func.func @transform_4(%arg0: i32, %arg1: i32, %arg2: i32) -> (i32, i32) {
    %c0_i32 = arith.constant 0 : i32
    %c0_i32_0 = arith.constant 0 : i32
    return %c0_i32, %arg2 : i32, i32
  }
  func.func @transform_5(%arg0: i32, %arg1: i32, %arg2: i32) -> (i32, i32) {
    %c0_i32 = arith.constant 0 : i32
    return %arg2, %arg1 : i32, i32
  }
  func.func @transform_6(%arg0: i32, %arg1: i32, %arg2: i32) -> (i32, i32) {
    %c0_i32 = arith.constant 0 : i32
    return %arg0, %arg1 : i32, i32
  }
}

</mosaic_0001>

<bundles_post_ra>
// kernel: kan_layer_pallas.1
= control target key start
LH: loop header
LB: loop body
LE: loop exit
PB: predicated region body
PF: predicated region fallthrough
CT: control target
= control target key end

     0   :  { %v31_v3 = vlaneseq  ;;  %v613_v4 = vmov 0.0|0.0   ;;  %vm614_vm0 = vmmov 0   ;;  %v615_v8 = vmov 0.0   ;;  %s1014_s0 = inlined_call_operand.vmem [shape: f32[8,128], index: 0, kind: input, shape index: {}]   ;;  %s1015_s1 = inlined_call_operand.vmem [shape: f32[16,128], index: 1, kind: input, shape index: {}]   ;;  %s1016_s2 = inlined_call_operand.vmem [shape: f32[16,128], index: 2, kind: input, shape index: {}]   ;;  %s1017_s3 = inlined_call_operand.vmem [shape: f32[16,128], index: 3, kind: input, shape index: {}]   ;;  %s1018_s4 = inlined_call_operand.vmem [shape: f32[1,128], index: 4, kind: input, shape index: {}]   ;;  %s1019_s5 = inlined_call_operand.vmem [shape: f32[128,128], index: 5, kind: input, shape index: {}]   ;;  %s1020_s6 = inlined_call_operand.hbm [shape: f32[8,128], index: 6, kind: output, shape index: {}]  }
   0x1   :  { %v375_v0 = vld [vmem:[%s1019_s5] sm:$0xff]  ;;  %v376_v1 = vld [vmem:[%s1019_s5 + $0x8] sm:$0xff]  ;;  %v377_v2 = vld [vmem:[%s1019_s5 + $0x10] sm:$0xff]  ;;  %529 = vmatprep.subr.bf16.mxu0 %v613_v4  ;;  %526 = vmatprep.mubr.msk.f32.mxu0 %vm614_vm0, %v615_v8 }
   0x2   :  { %v530_v5 = vpack.c.bf16 %v376_v1, %v375_v0  ;;  %v378_v6 = vld [vmem:[%s1019_s5 + $0x18] sm:$0xff]  ;;  %v379_v7 = vld [vmem:[%s1019_s5 + $0x20] sm:$0xff]  ;;  %v380_v9 = vld [vmem:[%s1019_s5 + $0x28] sm:$0xff]  ;;  %v681_v12 = vshrl.u32 %v31_v3, 7 }
   0x3   :  { %v674_v10 = vld [vmem:[%s1019_s5 + $0x30] sm:$0xff]  ;;  %v679_v11 = vld [vmem:[%s1019_s5 + $0x38] sm:$0xff]  ;;  %v533_v13 = vpack.c.bf16 %v378_v6, %v377_v2  ;;  %v686_v14 = vld [vmem:[%s1019_s5 + $0x40] sm:$0xff]  ;;  %v536_v19 = vpack.c.bf16 %v380_v9, %v379_v7 }
   0x4   :  { %531 = vmatpush3.bf16.msra.mxu0 %v530_v5  ;;  %v691_v15 = vld [vmem:[%s1019_s5 + $0x48] sm:$0xff]  ;;  %v697_v16 = vld [vmem:[%s1019_s5 + $0x50] sm:$0xff]  ;;  %v700_v17 = vsub.s32 0, %v681_v12  ;;  %v703_v18 = vsub.s32 1, %v681_v12  ;;  %v539_v20 = vpack.c.bf16 %v679_v11, %v674_v10  ;;  %v710_v21 = vld [vmem:[%s1019_s5 + $0x58] sm:$0xff]  ;;  %v723_v24 = vsub.s32 2, %v681_v12 }
   0x5   :  { %532 = vmatprep.subr.bf16.mxu0 %v613_v4  ;;  %v715_v22 = vld [vmem:[%s1014_s0] sm:$0xff]  ;;  %v726_v25 = vsub.s32 3, %v681_v12  ;;  %v542_v26 = vpack.c.bf16 %v691_v15, %v686_v14  ;;  %v738_v28 = vld [vmem:[%s1019_s5 + $0x68] sm:$0xff]  ;;  %v750_v32 = vsub.s32 4, %v681_v12  ;;  %v755_v33 = vld [vmem:[%s1019_s5 + $0x70] sm:$0xff]  ;;  %v545_v39 = vpack.c.bf16 %v710_v21, %v697_v16 }
   0x6   :  { %v720_v23 = vld [vmem:[%s1015_s1] sm:$0xff]  ;;  %v760_v34 = vld [vmem:[%s1019_s5 + $0x78] sm:$0xff]  ;;  %v781_v43 = vsub.s32 5, %v681_v12 }
   0x7   :  { %v733_v27 = vld [vmem:[%s1019_s5 + $0x60] sm:$0xff]  ;;  %v34_v30 = vrot.slane %v720_v23, %v700_v17  ;;  %v55_v31 = vrot.slane %v720_v23, %v703_v18  ;;  %v76_v37 = vrot.slane %v720_v23, %v723_v24 }
   0x8   :  { %v743_v29 = vld [vmem:[%s1016_s2] sm:$0xff]  ;;  %534 = vmatpush3.bf16.msra.mxu0 %v533_v13 }
   0x9   :  { %v39_v35 = vrot.slane %v743_v29, %v700_v17  ;;  %v60_v36 = vrot.slane %v743_v29, %v703_v18  ;;  %v81_v38 = vrot.slane %v743_v29, %v723_v24  ;;  %535 = vmatprep.subr.bf16.mxu0 %v613_v4  ;;  %v776_v40 = vld [vmem:[%s1017_s3] sm:$0xff]  ;;  %v35_v41 = vmul.f32 %v34_v30, %v715_v22 }
   0xa   :  { %v56_v42 = vmul.f32 %v55_v31, %v715_v22 }
   0xb   :  { %11 = vsyncpa [#allocation3], 0  ;;  %v548_v44 = vpack.c.bf16 %v738_v28, %v733_v27  ;;  %v77_v45 = vmul.f32 %v76_v37, %v715_v22  ;;  %v97_v46 = vrot.slane %v720_v23, %v726_v25  ;;  %v102_v47 = vrot.slane %v743_v29, %v726_v25  ;;  %v809_v56 = vld [vmem:[%s1015_s1 + $0x8] sm:$0xff]  ;;  %s616_s16 = smov [#allocation2]  }
   0xc   :  { %v551_v48 = vpack.c.bf16 %v760_v34, %v755_v33  ;;  %v792_v49 = vadd.f32 %v39_v35, %v35_v41  ;;  %v794_v50 = vadd.f32 %v60_v36, %v56_v42  ;;  %v118_v51 = vrot.slane %v720_v23, %v750_v32  ;;  %537 = vmatpush3.bf16.msra.mxu0 %v536_v19  ;;  %v839_v8 = vld [vmem:[%s1016_s2 + $0x8] sm:$0xff]  ;;  %s468_s17 = sshll.u32 %s616_s16, 4  ;;  %s469_s17 = int_to_ptr.vmem [resolvable:$true] %s468_s17 }
   0xd   :  { %v49_v52 = vrot.slane %v776_v40, %v700_v17  ;;  %v800_v53 = vadd.f32 %v81_v38, %v77_v45  ;;  %v98_v54 = vmul.f32 %v97_v46, %v715_v22  ;;  %v123_v55 = vrot.slane %v743_v29, %v750_v32  ;;  %538 = vmatprep.subr.bf16.mxu0 %v613_v4  ;;  %s589_s18 = scalar_lea.vmem %s469_s17, 128  ;;  %p594_p1 = scmp.lt.s32.totalorder %s469_s17, %s469_s17 }
   0xe   :  { %v41_v57 = vmul.f32 0.5, %v792_v49  ;;  %v62_v58 = vmul.f32 0.5, %v794_v50  ;;  %v119_v59 = vmul.f32 %v118_v51, %v715_v22  ;;  %v139_v60 = vrot.slane %v720_v23, %v781_v43  ;;  %p590_p0 = scmp.ne.s32.totalorder %s469_s17, %s589_s18  ;;  %p595_p2 = scmp.lt.s32.totalorder %s589_s18, %s589_s18 }
   0xf   :  { %v70_v61 = vrot.slane %v776_v40, %v703_v18  ;;  %v83_v62 = vmul.f32 0.5, %v800_v53  ;;  %v819_v63 = vadd.f32 %v102_v47, %v98_v54  ;;  %v144_v0 = vrot.slane %v743_v29, %v781_v43 }
  0x10   :  { %557 = vtanh.f32 %v41_v57  ;;  %v823_v1 = vadd.f32 %v123_v55, %v119_v59  ;;  %v140_v2 = vmul.f32 %v139_v60, %v715_v22  ;;  %v827_v3 = vsub.s32 6, %v681_v12  ;;  %540 = vmatpush3.bf16.msra.mxu0 %v539_v20  ;;  %p596_p3 = por %p595_p2, %p594_p1 }
  0x11   :  { %559 = vtanh.f32 %v62_v58  ;;  %v104_v5 = vmul.f32 0.5, %v819_v63  ;;  %v831_v6 = vsub.s32 7, %v681_v12  ;;  %v202_v7 = vrot.slane %v809_v56, %v700_v17  ;;  %541 = vmatprep.subr.bf16.mxu0 %v613_v4 }
  0x12   :  { %561 = vtanh.f32 %v83_v62  ;;  %v125_v9 = vmul.f32 0.5, %v823_v1  ;;  %v842_v10 = vadd.f32 %v144_v0, %v140_v2  ;;  %v160_v11 = vrot.slane %v720_v23, %v827_v3  ;;  %p597_p4 = pnand %p596_p3, %p590_p0 }
  0x13   :  { %v91_v12 = vrot.slane %v776_v40, %v723_v24  ;;  %563 = vtanh.f32 %v104_v5  ;;  %v165_v13 = vrot.slane %v743_v29, %v827_v3  ;;  %v181_v19 = vrot.slane %v720_v23, %v831_v6 }
  0x14   :  { %565 = vtanh.f32 %v125_v9  ;;  %v146_v20 = vmul.f32 0.5, %v842_v10  ;;  %v161_v30 = vmul.f32 %v160_v11, %v715_v22  ;;  %v186_v31 = vrot.slane %v743_v29, %v831_v6  ;;  %543 = vmatpush3.bf16.msra.mxu0 %v542_v26 }
  0x15   :  { %v112_v35 = vrot.slane %v776_v40, %v726_v25  ;;  %v182_v36 = vmul.f32 %v181_v19, %v715_v22  ;;  %v203_v37 = vmul.f32 %v202_v7, %v715_v22  ;;  %v207_v23 = vrot.slane %v839_v8, %v700_v17  ;;  %544 = vmatprep.subr.bf16.mxu0 %v613_v4 }
  0x16   :  { %v133_v38 = vrot.slane %v776_v40, %v750_v32  ;;  %567 = vtanh.f32 %v146_v20  ;;  %v868_v29 = vadd.f32 %v165_v13, %v161_v30  ;;  %v223_v14 = vrot.slane %v809_v56, %v703_v18 }
  0x17   :  { %v154_v15 = vrot.slane %v776_v40, %v781_v43  ;;  %v874_v26 = vadd.f32 %v186_v31, %v182_v36  ;;  %v876_v41 = vadd.f32 %v207_v23, %v203_v37  ;;  %v228_v42 = vrot.slane %v839_v8, %v703_v18 }
  0x18   :  { %v167_v45 = vmul.f32 0.5, %v868_v29  ;;  %v224_v46 = vmul.f32 %v223_v14, %v715_v22  ;;  %v244_v47 = vrot.slane %v809_v56, %v723_v24  ;;  %v249_v51 = vrot.slane %v839_v8, %v723_v24  ;;  %546 = vmatpush3.bf16.msra.mxu0 %v545_v39 }
  0x19   :  { %v175_v54 = vrot.slane %v776_v40, %v827_v3  ;;  %v188_v55 = vmul.f32 0.5, %v874_v26  ;;  %v209_v57 = vmul.f32 0.5, %v876_v41  ;;  %v265_v58 = vrot.slane %v809_v56, %v726_v25  ;;  %547 = vmatprep.subr.bf16.mxu0 %v613_v4 }
  0x1a   :  { %v558_v59 = vpop.eup %557  ;;  %569 = vtanh.f32 %v167_v45  ;;  %v896_v60 = vadd.f32 %v228_v42, %v224_v46  ;;  %v245_v62 = vmul.f32 %v244_v47, %v715_v22  ;;  %v270_v16 = vrot.slane %v839_v8, %v726_v25  ;;  %v921_v46 = vld [vmem:[%s1017_s3 + $0x8] sm:$0xff] }
  0x1b   :  { %v560_v21 = vpop.eup %559  ;;  %v43_v39 = vmul.f32 0.5, %v558_v59  ;;  %571 = vtanh.f32 %v188_v55  ;;  %v196_v0 = vrot.slane %v776_v40, %v831_v6  ;;  %v266_v2 = vmul.f32 %v265_v58, %v715_v22 }
  0x1c   :  { %v562_v5 = vpop.eup %561  ;;  %v64_v7 = vmul.f32 0.5, %v560_v21  ;;  %573 = vtanh.f32 %v209_v57  ;;  %v230_v9 = vmul.f32 0.5, %v896_v60  ;;  %v905_v11 = vadd.f32 %v249_v51, %v245_v62  ;;  %549 = vmatpush3.bf16.msra.mxu0 %v548_v44 }
  0x1d   :  { %v564_v13 = vpop.eup %563  ;;  %v44_v19 = vadd.f32 0.5, %v43_v39  ;;  %v85_v20 = vmul.f32 0.5, %v562_v5  ;;  %v910_v30 = vadd.f32 %v270_v16, %v266_v2  ;;  %v286_v31 = vrot.slane %v809_v56, %v750_v32  ;;  %550 = vmatprep.subr.bf16.mxu0 %v613_v4 }
  0x1e   :  { %v566_v36 = vpop.eup %565  ;;  %v65_v37 = vadd.f32 0.5, %v64_v7  ;;  %v106_v23 = vmul.f32 0.5, %v564_v13  ;;  %575 = vtanh.f32 %v230_v9  ;;  %v251_v14 = vmul.f32 0.5, %v905_v11 }
  0x1f   :  { %v45_v42 = vmul.f32 %v44_v19, %v792_v49  ;;  %v86_v45 = vadd.f32 0.5, %v85_v20  ;;  %v127_v27 = vmul.f32 0.5, %v566_v36  ;;  %v272_v28 = vmul.f32 0.5, %v910_v30 }
  0x20   :  { %v568_v44 = vpop.eup %567  ;;  %v66_v47 = vmul.f32 %v65_v37, %v794_v50  ;;  %v107_v4 = vadd.f32 0.5, %v106_v23  ;;  %577 = vtanh.f32 %v251_v14  ;;  %v287_v51 = vmul.f32 %v286_v31, %v715_v22  ;;  %552 = vmatpush3.bf16.msra.mxu0 %v551_v48 }
  0x21   :  { %v50_v49 = vmul.f32 %v49_v52, %v45_v42  ;;  %v87_v55 = vmul.f32 %v86_v45, %v800_v53  ;;  %v128_v57 = vadd.f32 0.5, %v127_v27  ;;  %v148_v58 = vmul.f32 0.5, %v568_v44 }
  0x22   :  { %v71_v50 = vmul.f32 %v70_v61, %v66_v47  ;;  %v108_v59 = vmul.f32 %v107_v4, %v819_v63  ;;  %579 = vtanh.f32 %v272_v28  ;;  %v291_v62 = vrot.slane %v839_v8, %v750_v32 }
  0x23   :  { %v92_v33 = vmul.f32 %v91_v12, %v87_v55  ;;  %v129_v34 = vmul.f32 %v128_v57, %v823_v1  ;;  %v149_v48 = vadd.f32 0.5, %v148_v58  ;;  %v217_v52 = vrot.slane %v921_v46, %v700_v17 }
  0x24   :  { %v570_v53 = vpop.eup %569  ;;  %v72_v16 = vadd.f32 %v71_v50, %v50_v49  ;;  %v113_v61 = vmul.f32 %v112_v35, %v108_v59  ;;  %v947_v63 = vadd.f32 %v291_v62, %v287_v51  ;;  %v307_v21 = vrot.slane %v809_v56, %v781_v43 }
  0x25   :  { %v572_v39 = vpop.eup %571  ;;  %v134_v1 = vmul.f32 %v133_v38, %v129_v34  ;;  %v150_v12 = vmul.f32 %v149_v48, %v842_v10  ;;  %v169_v2 = vmul.f32 0.5, %v570_v53  ;;  %v312_v17 = vrot.slane %v839_v8, %v781_v43 }
  0x26   :  { %v574_v5 = vpop.eup %573  ;;  %v93_v7 = vadd.f32 %v92_v33, %v72_v16  ;;  %v190_v9 = vmul.f32 0.5, %v572_v39  ;;  %v293_v35 = vmul.f32 0.5, %v947_v63  ;;  %v308_v13 = vmul.f32 %v307_v21, %v715_v22 }
  0x27   :  { %v155_v19 = vmul.f32 %v154_v15, %v150_v12  ;;  %v170_v20 = vadd.f32 0.5, %v169_v2  ;;  %v211_v31 = vmul.f32 0.5, %v574_v5  ;;  %v238_v10 = vrot.slane %v921_v46, %v703_v18 }
  0x28   :  { %v576_v38 = vpop.eup %575  ;;  %v114_v36 = vadd.f32 %v113_v61, %v93_v7  ;;  %v191_v37 = vadd.f32 0.5, %v190_v9  ;;  %581 = vtanh.f32 %v293_v35  ;;  %v313_v23 = vadd.f32 %v312_v17, %v308_v13 }
  0x29   :  { %v171_v14 = vmul.f32 %v170_v20, %v868_v29  ;;  %v212_v42 = vadd.f32 0.5, %v211_v31  ;;  %v232_v45 = vmul.f32 0.5, %v576_v38  ;;  %v328_v27 = vrot.slane %v809_v56, %v827_v3 }
  0x2a   :  { %v578_v28 = vpop.eup %577  ;;  %v135_v44 = vadd.f32 %v134_v1, %v114_v36  ;;  %v192_v15 = vmul.f32 %v191_v37, %v874_v26  ;;  %v314_v47 = vmul.f32 0.5, %v313_v23  ;;  %v333_v18 = vrot.slane %v839_v8, %v827_v3 }
  0x2b   :  { %v176_v4 = vmul.f32 %v175_v54, %v171_v14  ;;  %v213_v51 = vmul.f32 %v212_v42, %v876_v41  ;;  %v233_v29 = vadd.f32 0.5, %v232_v45  ;;  %v253_v49 = vmul.f32 0.5, %v578_v28 }
  0x2c   :  { %v580_v55 = vpop.eup %579  ;;  %v156_v57 = vadd.f32 %v155_v19, %v135_v44  ;;  %v197_v58 = vmul.f32 %v196_v0, %v192_v15  ;;  %583 = vtanh.f32 %v314_v47  ;;  %v329_v26 = vmul.f32 %v328_v27, %v715_v22 }
  0x2d   :  { %v234_v50 = vmul.f32 %v233_v29, %v896_v60  ;;  %v254_v59 = vadd.f32 0.5, %v253_v49  ;;  %v259_v62 = vrot.slane %v921_v46, %v723_v24  ;;  %v274_v54 = vmul.f32 0.5, %v580_v55 }
  0x2e   :  { %v177_v33 = vadd.f32 %v176_v4, %v156_v57  ;;  %v218_v41 = vmul.f32 %v217_v52, %v213_v51  ;;  %v334_v34 = vadd.f32 %v333_v18, %v329_v26  ;;  %v349_v48 = vrot.slane %v809_v56, %v831_v6  ;;  %v476_v18 = vld [vmem:[%s1018_s4] ss:$0 sm:$0xff] }
  0x2f   :  { %v255_v53 = vmul.f32 %v254_v59, %v905_v11  ;;  %v275_v40 = vadd.f32 0.5, %v274_v54  ;;  %v354_v0 = vrot.slane %v839_v8, %v831_v6  ;;  %v239_v61 = vmul.f32 %v238_v10, %v234_v50 }
  0x30   :  { %v198_v16 = vadd.f32 %v197_v58, %v177_v33  ;;  %v335_v60 = vmul.f32 0.5, %v334_v34  ;;  %v350_v21 = vmul.f32 %v349_v48, %v715_v22  ;;  %v280_v52 = vrot.slane %v921_v46, %v726_v25 }
  0x31   :  { %v276_v24 = vmul.f32 %v275_v40, %v910_v30  ;;  %v260_v12 = vmul.f32 %v259_v62, %v255_v53  ;;  %v301_v7 = vrot.slane %v921_v46, %v750_v32  ;;  %v322_v20 = vrot.slane %v921_v46, %v781_v43 }
  0x32   :  { %v582_v39 = vpop.eup %581  ;;  %v219_v1 = vadd.f32 %v218_v41, %v198_v16  ;;  %585 = vtanh.f32 %v335_v60  ;;  %v355_v56 = vadd.f32 %v354_v0, %v350_v21  ;;  %v343_v32 = vrot.slane %v921_v46, %v827_v3 }
  0x33   :  { %v295_v11 = vmul.f32 0.5, %v582_v39  ;;  %v281_v5 = vmul.f32 %v280_v52, %v276_v24  ;;  %v364_v15 = vrot.slane %v921_v46, %v831_v6 }
  0x34   :  { %v240_v2 = vadd.f32 %v239_v61, %v219_v1  ;;  %v356_v17 = vmul.f32 0.5, %v355_v56 }
  0x35   :  { %v296_v8 = vadd.f32 0.5, %v295_v11 }
  0x36   :  { %v584_v9 = vpop.eup %583  ;;  %v261_v22 = vadd.f32 %v260_v12, %v240_v2  ;;  %587 = vtanh.f32 %v356_v17 }
  0x37   :  { %v297_v30 = vmul.f32 %v296_v8, %v947_v63  ;;  %v316_v35 = vmul.f32 0.5, %v584_v9 }
  0x38   :  { %v282_v25 = vadd.f32 %v281_v5, %v261_v22 }
  0x39   :  { %v302_v13 = vmul.f32 %v301_v7, %v297_v30  ;;  %v317_v19 = vadd.f32 0.5, %v316_v35 }
  0x3b   :  { %v318_v31 = vmul.f32 %v317_v19, %v313_v23  ;;  %v303_v38 = vadd.f32 %v302_v13, %v282_v25 }
  0x3c   :  { %v586_v10 = vpop.eup %585 }
  0x3d   :  { %v323_v36 = vmul.f32 %v322_v20, %v318_v31  ;;  %v337_v37 = vmul.f32 0.5, %v586_v10 }
  0x3f   :  { %v338_v14 = vadd.f32 0.5, %v337_v37  ;;  %v324_v45 = vadd.f32 %v323_v36, %v303_v38 }
  0x40   :  { %v588_v42 = vpop.eup %587 }
  0x41   :  { %v339_v27 = vmul.f32 %v338_v14, %v334_v34  ;;  %v358_v63 = vmul.f32 0.5, %v588_v42 }
  0x43   :  { %v344_v28 = vmul.f32 %v343_v32, %v339_v27  ;;  %v359_v44 = vadd.f32 0.5, %v358_v63 }
  0x45   :  { %v345_v47 = vadd.f32 %v344_v28, %v324_v45  ;;  %v360_v43 = vmul.f32 %v359_v44, %v355_v56 }
  0x47   :  { %v365_v23 = vmul.f32 %v364_v15, %v360_v43 }
  0x49   :  { %v366_v4 = vadd.f32 %v365_v23, %v345_v47 }
  0x4b   :  { %v374_v51 = vadd.f32 %v476_v18, %v366_v4 }
  0x4d   :  { %527 = vmatmul.mubr.f32.vlgmr.msra.gmra.mrb[0].mxu0 %v374_v51 }
 0x120   :  { %v457_v3 = vpop.f32.mrb[0].mxu0 }
 0x121   :  { %461 = vst [vmem:[#allocation2] sm:$0xff] %v457_v3  ;;  %v528_v29 = vpop.f32.mrb[1].mxu0 }
 0x122   :  { %600 = shalt.err (!%p597_p4)
}
 0x123   :  { %s601_s4 = scalar_lea.hbm %s1020_s6, 128 }
 0x124   :  { %p602_p5 = scmp.ne.s32.totalorder %s1020_s6, %s601_s4  ;;  %p605_p6 = scmp.lt.u32.totalorder %s601_s4, %s1020_s6 }
 0x126   :  { %p607_p7 = pnand %p605_p6, %p602_p5 }
 0x128   :  { %610 = shalt.err (!%p607_p7)
}
 0x129   :  { %471 = dma.vmem_to_hbm [thread:$0]  %s469_s17, 128, %s1020_s6, [#allocation3]  }
 0x12a   :  { %611 = dma.done.wait [#allocation3], 128  }
 0x12b   :  { %612 = vsyncadd [#allocation3], 4294967168 }
 0x12c   :  { %475 = vsyncpa [#allocation3], 1 }

</bundles_post_ra>
